<compile_context>
chip_gen: v7x
topology: tpu7x:2x2x1
jax: 0.10.0
libtpu: 0.0.40
codegen_flags: <defaults>
</compile_context>

<pallas_src>
import math

import jax
import jax.numpy as jnp
from jax.experimental import pallas as pl
from jax.experimental.pallas import tpu as pltpu

_MiB = 1024 * 1024


def _build_pe(d_model: int, max_len: int, dtype=jnp.float32) -> jnp.ndarray:
    """Sine/cosine positional-encoding buffer, shape (d_model, max_len), pre-cast to dtype.

    Mirrors the PyTorch __init__:
      pe[0::2, :] = sin(div_term * position)
      pe[1::2, :] = cos(div_term * position)
    """
    # Same latent assumption as the PyTorch original (odd d_model would shape-mismatch).
    assert d_model % 2 == 0, "d_model must be even"
    position = jnp.arange(0, max_len, dtype=jnp.float32)                        # (max_len,)
    div_term = jnp.exp(
        jnp.arange(0, d_model, 2, dtype=jnp.float32) * (-math.log(10000.0) / d_model)
    )[:, None]                                                                   # (d_model//2, 1)
    pe = jnp.zeros((d_model, max_len), dtype=jnp.float32)
    pe = pe.at[0::2, :].set(jnp.sin(div_term * position))
    pe = pe.at[1::2, :].set(jnp.cos(div_term * position))
    # Cast ONCE at init so the per-call wrapper never emits an astype copy kernel.
    return pe.astype(dtype)


# ---------------------------------------------------------------------------
# Kernel (the add itself is trivial; all the work is in the BlockSpecs)
# ---------------------------------------------------------------------------

def _pe_add_kernel(x_ref, pe_ref, o_ref):
    # x_ref/o_ref: (tb, td, L); pe_ref: (td, L) broadcast over the batch dim.
    o_ref[...] = x_ref[...] + pe_ref[...]


# ---------------------------------------------------------------------------
# VMEM budgeting / block-size selection
# ---------------------------------------------------------------------------

def _vmem_capacity_bytes() -> int:
    """Physical per-core VMEM (64 MiB on v7x, 128 MiB on v5e/v6e)."""
    cap = 64 * _MiB                       # conservative default if the query fails
    try:
        c = int(getattr(pltpu.get_tpu_info(), "vmem_capacity_bytes", cap))
        if c > 0:
            cap = c
    except Exception:
        pass
    return cap


def _choose_block(B, d_model, L, itemsize, budget, target_x):
    """Pick (tb, td) for an x block of shape (tb, td, L).

    Hard constraint: est(tb, td) <= budget (x + out double-buffered + pe double-buffered).
    Soft constraint: x block bytes <= target_x (keeps >= 2 grid steps on big tensors).
    """

    def est(tb, td):
        x_blk = tb * td * L * itemsize
        pe_blk = td * L * itemsize
        return 4 * x_blk + 2 * pe_blk, x_blk

    # d_model tiles: full d_model first (pe becomes a single, effectively resident
    # block), then multiple-of-8 divisors, descending -> longest contiguous DMA runs
    # and fewest pe re-fetches. Every candidate is legal for the (8,128) rule:
    # either a multiple of 8 or equal to the full dim.
    td_cands = sorted({d_model} | {d for d in range(8, d_model, 8) if d_model % d == 0},
                      reverse=True)
    tb_cands = [b for b in range(B, 0, -1) if B % b == 0]

    best = None        # largest block that also respects the soft byte target
    smallest = None    # smallest block that respects only the hard VMEM budget
    for td in td_cands:
        for tb in tb_cands:
            tot, x_blk = est(tb, td)
            if tot > budget:
                continue
            if smallest is None or x_blk < smallest[0]:
                smallest = (x_blk, tb, td)
            if x_blk <= target_x:
                if best is None or x_blk > best[0]:
                    best = (x_blk, tb, td)
                break      # tb_cands descending: first fit is the largest valid tb
    if best is not None:
        return best[1], best[2]
    if smallest is not None:           # every budget-fitting block exceeds the soft
        return smallest[1], smallest[2]  # target: take the one closest to it
    # Even (1, min_td, L) exceeds the budget (would need an absurd max_len for this module).
    # TODO(synk): also tile the lane (L) axis in multiples of 128 for extreme max_len.
    return 1, td_cands[-1]


# ---------------------------------------------------------------------------
# Wrapper
# ---------------------------------------------------------------------------

def sine_positional_encoding(x: jnp.ndarray, pe: jnp.ndarray, *, donate_x: bool = False) -> jnp.ndarray:
    """Eval-mode forward: x + pe[:, :L] (dropout == identity).

    x:  (B, d_model, L)
    pe: (d_model, max_len) buffer from _build_pe (ideally already in x.dtype).
    donate_x: set True only when the caller donates x at the jit boundary
      (donate_argnums); then the output aliases x and no extra HBM allocation is
      made. The default (False) avoids XLA inserting a defensive full copy of x.
    """
    B, d_model, L = x.shape
    max_len = pe.shape[-1]
    assert pe.shape[0] == d_model and L <= max_len
    itemsize = jnp.dtype(x.dtype).itemsize

    if pe.dtype != x.dtype:            # avoided entirely when pe was built in x.dtype
        pe = pe.astype(x.dtype)

    # Pass the full pe buffer whenever the (td, L) window is legal on it (last block
    # dim equal to the array dim, or a multiple of 128); the BlockSpec then only ever
    # touches columns < L. Only a ragged L < max_len pays a small slice copy.
    if L == max_len or L % 128 == 0:
        pe_in = pe
    else:
        pe_in = pe[:, :L]

    # --- VMEM budget & block-size selection -----------------------------------
    cap = _vmem_capacity_bytes()
    if cap >= 128 * _MiB:
        budget = cap // 2                          # v5e / v6e: up to 64 MiB of buffers
    else:
        budget = min(cap // 2, 24 * _MiB)          # v7x: 64 MiB per TensorCore
    vmem_limit = int(min(cap * 3 // 4, 96 * _MiB))  # raise scoped limit, keep headroom

    total_x = B * d_model * L * itemsize
    target_x = 8 * _MiB                            # >=1 MiB blocks hit ~85%+ of HBM roofline
    if total_x >= 2 * _MiB:
        # Keep >= 2 grid steps so v7x can shard the grid across its 2 TensorCores.
        target_x = min(target_x, max(1 * _MiB, total_x // 2))

    tb, td = _choose_block(B, d_model, L, itemsize, budget, target_x)
    n_d, n_b = d_model // td, B // tb

    # --- grid / BlockSpecs ------------------------------------------------------
    # Batch innermost -> pe block index constant across consecutive steps (DMA'd once
    # per d-tile). The outermost axis is whichever one is non-trivial, so megacore
    # sharding always sees a splittable leading "parallel" axis.
    if n_d > 1:
        grid = (n_d, n_b)
        x_map = lambda d, b: (b, d, 0)
        pe_map = lambda d, b: (d, 0)
    else:
        grid = (n_b,)
        x_map = lambda b: (b, 0, 0)
        pe_map = lambda b: (0, 0)

    x_spec = pl.BlockSpec((tb, td, L), x_map)
    pe_spec = pl.BlockSpec((td, L), pe_map)

    cost = pl.CostEstimate(
        flops=B * d_model * L,
        bytes_accessed=(2 * B + 1) * d_model * L * itemsize,
        transcendentals=0,
    )

    return pl.pallas_call(
        _pe_add_kernel,
        out_shape=jax.ShapeDtypeStruct((B, d_model, L), x.dtype),
        grid_spec=pltpu.PrefetchScalarGridSpec(
            num_scalar_prefetch=0,
            grid=grid,
            in_specs=[x_spec, pe_spec],
            out_specs=x_spec,
        ),
        compiler_params=pltpu.CompilerParams(
            dimension_semantics=("parallel",) * len(grid),
            vmem_limit_bytes=vmem_limit,
        ),
        cost_estimate=cost,
        input_output_aliases={0: 0} if donate_x else {},
    )(x, pe_in)


if __name__ == "__main__":
    key = jax.random.PRNGKey(0)
    k1, k2, k3, k4 = jax.random.split(key, 4)

    # Module config mirroring the PyTorch defaults.
    d_model, max_len = 32, 256
    pe = _build_pe(d_model, max_len, dtype=jnp.float32)

    # Case 1: tiny ragged L (< 128).
    B1, L1 = 2, 16
    x1 = jax.random.normal(k1, (B1, d_model, L1), dtype=jnp.float32)
    ref1 = x1 + pe[:, :L1][None, :, :]
    out1 = jax.block_until_ready(sine_positional_encoding(x1, pe))
    assert out1.shape == (B1, d_model, L1)
    assert jnp.allclose(out1, ref1, atol=1e-6), "mismatch (tiny ragged L)"

    # Case 2: ragged L (not a multiple of 128, < max_len).
    B2, L2 = 2, 100
    x2 = jax.random.normal(k2, (B2, d_model, L2), dtype=jnp.float32)
    ref2 = x2 + pe[:, :L2][None, :, :]
    out2 = jax.block_until_ready(sine_positional_encoding(x2, pe))
    assert out2.shape == (B2, d_model, L2)
    assert jnp.allclose(out2, ref2, atol=1e-6), "mismatch (ragged L)"

    # Case 3: L == max_len (full pe buffer passed straight through, no wrapper slice).
    B3, L3 = 2, 256
    x3 = jax.random.normal(k3, (B3, d_model, L3), dtype=jnp.float32)
    ref3 = x3 + pe[None, :, :]
    out3 = jax.block_until_ready(sine_positional_encoding(x3, pe))
    assert out3.shape == (B3, d_model, L3)
    assert jnp.allclose(out3, ref3, atol=1e-6), "mismatch (L == max_len)"

    # Case 4: >= 2 MiB tensor -> multi-step grid; called through jit with x donated so
    # input_output_aliases actually takes effect (output reuses x's HBM buffer).
    d_big = 256
    pe_big = _build_pe(d_big, max_len, dtype=jnp.float32)
    B4, L4 = 8, 256
    x4 = jax.random.normal(k4, (B4, d_big, L4), dtype=jnp.float32)
    ref4 = x4 + pe_big[None, :, :]
    f_donated = jax.jit(
        lambda xx: sine_positional_encoding(xx, pe_big, donate_x=True),
        donate_argnums=0,
    )
    out4 = jax.block_until_ready(f_donated(x4))
    assert out4.shape == (B4, d_big, L4)
    assert jnp.allclose(out4, ref4, atol=1e-6), "mismatch (donated, multi-block)"

    print("KERNEL_OK")
</pallas_src>

<mosaic_0001>
module attributes {stable_mosaic.version = 11 : i64} {
  func.func @_pe_add_kernel(%arg0: i32, %arg1: memref<2x32x16xf32, #tpu.memory_space<vmem>>, %arg2: memref<32x16xf32, #tpu.memory_space<vmem>>, %arg3: memref<2x32x16xf32, #tpu.memory_space<vmem>>) attributes {dimension_semantics = [#tpu.dimension_semantics<parallel>], iteration_bounds = array<i64: 1>, scalar_prefetch = 0 : i64, scratch_operands = 0 : i64, tpu.core_type = #tpu.core_type<tc>, window_params = [{transform_indices = @transform_0, window_bounds = array<i64: 2, 32, 16>}, {pipeline_mode = #tpu.pipeline_mode<synchronous>, transform_indices = @transform_1, window_bounds = array<i64: 32, 16>}, {transform_indices = @transform_2, window_bounds = array<i64: 2, 32, 16>}]} {
    %c0 = arith.constant 0 : index
    %c0_0 = arith.constant 0 : index
    %c0_1 = arith.constant 0 : index
    %0 = vector.load %arg1[%c0, %c0_0, %c0_1] : memref<2x32x16xf32, #tpu.memory_space<vmem>>, vector<2x32x16xf32>
    %c0_2 = arith.constant 0 : index
    %c0_3 = arith.constant 0 : index
    %1 = vector.load %arg2[%c0_2, %c0_3] : memref<32x16xf32, #tpu.memory_space<vmem>>, vector<32x16xf32>
    %2 = vector.shape_cast %1 : vector<32x16xf32> to vector<1x32x16xf32>
    %3 = vector.broadcast %2 : vector<1x32x16xf32> to vector<2x32x16xf32>
    %4 = arith.addf %0, %3 : vector<2x32x16xf32>
    %c0_4 = arith.constant 0 : index
    %c0_5 = arith.constant 0 : index
    %c0_6 = arith.constant 0 : index
    %5 = vector.load %arg3[%c0_4, %c0_5, %c0_6] : memref<2x32x16xf32, #tpu.memory_space<vmem>>, vector<2x32x16xf32>
    tpu.vector_store %arg3[%c0_4, %c0_5, %c0_6], %4 {strides = array<i32>} : memref<2x32x16xf32, #tpu.memory_space<vmem>>, vector<2x32x16xf32>,
    return
  }
  func.func @transform_0(%arg0: i32) -> (i32, i32, i32) {
    %c0_i32 = arith.constant 0 : i32
    %c0_i32_0 = arith.constant 0 : i32
    %c0_i32_1 = arith.constant 0 : i32
    return %arg0, %c0_i32, %c0_i32_0 : i32, i32, i32
  }
  func.func @transform_1(%arg0: i32) -> (i32, i32) {
    %c0_i32 = arith.constant 0 : i32
    %c0_i32_0 = arith.constant 0 : i32
    %c0_i32_1 = arith.constant 0 : i32
    return %c0_i32, %c0_i32_0 : i32, i32
  }
  func.func @transform_2(%arg0: i32) -> (i32, i32, i32) {
    %c0_i32 = arith.constant 0 : i32
    %c0_i32_0 = arith.constant 0 : i32
    %c0_i32_1 = arith.constant 0 : i32
    return %arg0, %c0_i32, %c0_i32_0 : i32, i32, i32
  }
}

</mosaic_0001>

<bundles_post_ra>
// kernel: tpu_custom_call.1
= control target key start
LH: loop header
LB: loop body
LE: loop exit
PB: predicated region body
PF: predicated region fallthrough
CT: control target
= control target key end

     0   :  { %vm31_vm0 = vcmask 130048   ;;  %s127_s0 = inlined_call_operand.vmem [shape: f32[2,32,16], index: 0, kind: input, shape index: {}]   ;;  %s128_s1 = inlined_call_operand.vmem [shape: f32[32,16], index: 1, kind: input, shape index: {}]   ;;  %s129_s2 = inlined_call_operand.vmem [shape: f32[2,32,16], index: 2, kind: output, shape index: {}]  }
   0x1   :  { %v11_v0 = vld [vmem:[%s127_s0] sm:$0xff]  ;;  %v12_v2 = vld [vmem:[%s127_s0 + $0x8] sm:$0xff]  ;;  %v13_v5 = vld [vmem:[%s127_s0 + $0x10] sm:$0xff] }
   0x2   :  { %v19_v1 = vld [vmem:[%s128_s1] sm:$0xff]  ;;  %v20_v4 = vld [vmem:[%s128_s1 + $0x8] sm:$0xff]  ;;  %v21_v6 = vld [vmem:[%s128_s1 + $0x10] sm:$0xff] }
   0x3   :  { %v23_v3 = vadd.f32 %v19_v1, %v11_v0  ;;  %v24_v7 = vadd.f32 %v20_v4, %v12_v2  ;;  %v25_v8 = vadd.f32 %v21_v6, %v13_v5  ;;  %v14_v9 = vld [vmem:[%s127_s0 + $0x18] sm:$0xff]  ;;  %v15_v11 = vld [vmem:[%s127_s0 + $0x20] sm:$0xff]  ;;  %v16_v14 = vld [vmem:[%s127_s0 + $0x28] sm:$0xff] }
   0x4   :  { %v22_v10 = vld [vmem:[%s128_s1 + $0x18] sm:$0xff]  ;;  %v27_v13 = vadd.f32 %v19_v1, %v15_v11  ;;  %v17_v15 = vld [vmem:[%s127_s0 + $0x30] sm:$0xff]  ;;  %v28_v17 = vadd.f32 %v20_v4, %v16_v14 }
   0x5   :  { %32 = vst.msk [vmem:[%s129_s2] sm:$0xff] %vm31_vm0, %v23_v3  ;;  %v26_v12 = vadd.f32 %v22_v10, %v14_v9  ;;  %v18_v16 = vld [vmem:[%s127_s0 + $0x38] sm:$0xff]  ;;  %33 = vst.msk [vmem:[%s129_s2 + $0x8] sm:$0xff] %vm31_vm0, %v24_v7  ;;  %v29_v18 = vadd.f32 %v21_v6, %v17_v15 }
   0x6   :  { %34 = vst.msk [vmem:[%s129_s2 + $0x10] sm:$0xff] %vm31_vm0, %v25_v8  ;;  %v30_v19 = vadd.f32 %v22_v10, %v18_v16  ;;  %36 = vst.msk [vmem:[%s129_s2 + $0x20] sm:$0xff] %vm31_vm0, %v27_v13 }
   0x7   :  { %35 = vst.msk [vmem:[%s129_s2 + $0x18] sm:$0xff] %vm31_vm0, %v26_v12  ;;  %37 = vst.msk [vmem:[%s129_s2 + $0x28] sm:$0xff] %vm31_vm0, %v28_v17 }
   0x8   :  { %38 = vst.msk [vmem:[%s129_s2 + $0x30] sm:$0xff] %vm31_vm0, %v29_v18  ;;  %39 = vst.msk [vmem:[%s129_s2 + $0x38] sm:$0xff] %vm31_vm0, %v30_v19 }

</bundles_post_ra>
